<compile_context>
chip_gen: v5e
topology: v5e:2x2
jax: 0.10.0
libtpu: 0.0.40
codegen_flags: <defaults>
</compile_context>

<pallas_src>
import numpy as np
import jax
import jax.numpy as jnp
from jax.experimental import pallas as pl
from jax.experimental.pallas import tpu as pltpu


_MAX_TILE_R = 128                      # 2 x (128,128) f32 accumulators = 32 vregs (no spills)
_MAX_TILE_M = 8192                     # lane cap (bounds unrolled chunk count)
_BLOCK_BYTE_BUDGET = 4 * 1024 * 1024   # ~4 MiB input block, double buffered
_VMEM_LIMIT_BYTES = 40 * 1024 * 1024   # safe on v7x (64 MiB physical), fine on v5e/v6e


def _round_down(x, m):
    return (x // m) * m


def _fill_values(dtype):
    """(lo, hi) identity fill values for max/min of this dtype."""
    dtype = jnp.dtype(dtype)
    if jnp.issubdtype(dtype, jnp.floating):
        return float("-inf"), float("inf")
    if jnp.issubdtype(dtype, jnp.integer):
        info = jnp.iinfo(dtype)
        return int(info.min), int(info.max)
    raise TypeError(f"unsupported dtype for range tracking: {dtype}")


def _make_minmax_kernel(tile_r, n_full_body, last_n_full, last_rem, grid_m,
                        lo_fill, hi_fill, dtype):
    """Kernel producing lane-dense (tile_r, 128) running min/max partials."""

    def fold(x_ref, min_ref, max_ref, n_full, rem):
        # Carry the two (tile_r, 128) accumulators in vregs across the chunk
        # loop; touch the VMEM-resident output refs once per block.
        pmin = min_ref[...]
        pmax = max_ref[...]
        for c in range(n_full):                       # aligned 128-lane chunks
            xc = x_ref[:, c * 128:(c + 1) * 128]
            pmin = jnp.minimum(pmin, xc)
            pmax = jnp.maximum(pmax, xc)
        if rem:                                       # static partial tail chunk
            xr = x_ref[:, n_full * 128:n_full * 128 + rem]
            pmin = jnp.minimum(pmin, jnp.min(xr, axis=-1, keepdims=True))
            pmax = jnp.maximum(pmax, jnp.max(xr, axis=-1, keepdims=True))
        min_ref[...] = pmin
        max_ref[...] = pmax

    def kernel(x_ref, min_ref, max_ref):
        k = pl.program_id(1)

        @pl.when(k == 0)
        def _init():
            min_ref[...] = jnp.full((tile_r, 128), hi_fill, dtype=dtype)
            max_ref[...] = jnp.full((tile_r, 128), lo_fill, dtype=dtype)

        if grid_m == 1:
            # Single lane block: its valid extent is fully static.
            fold(x_ref, min_ref, max_ref, last_n_full, last_rem)
        elif last_n_full == n_full_body and last_rem == 0:
            # Lane axis divides evenly: one unmasked path for every block.
            fold(x_ref, min_ref, max_ref, n_full_body, 0)
        else:
            last = grid_m - 1

            @pl.when(k < last)
            def _bulk():
                fold(x_ref, min_ref, max_ref, n_full_body, 0)

            @pl.when(k == last)
            def _tail():
                fold(x_ref, min_ref, max_ref, last_n_full, last_rem)

    return kernel


def _minmax_partials(x2d):
    """Per-row lane-dense partials of a (R, M) array: ((R,128) min, (R,128) max)."""
    R, M = x2d.shape
    dtype = x2d.dtype
    dsize = jnp.dtype(dtype).itemsize
    lo_fill, hi_fill = _fill_values(dtype)

    # Rows: 128-row blocks (full extent when R is small).
    tile_r = R if R <= _MAX_TILE_R else _MAX_TILE_R
    # Lanes: byte-budgeted, multiple of 128; full extent when M fits the budget.
    lane_budget = max(128, _round_down(_BLOCK_BYTE_BUDGET // (tile_r * dsize), 128))
    lane_budget = min(lane_budget, _MAX_TILE_M)
    tile_m = M if M <= lane_budget else lane_budget

    grid = (pl.cdiv(R, tile_r), pl.cdiv(M, tile_m))
    grid_m = grid[1]
    n_full_body = tile_m // 128
    valid_last = M - (grid_m - 1) * tile_m           # static: valid lanes in last block
    last_n_full = valid_last // 128
    last_rem = valid_last % 128

    kernel = _make_minmax_kernel(tile_r, n_full_body, last_n_full, last_rem,
                                 grid_m, lo_fill, hi_fill, dtype)

    out_shape = (jax.ShapeDtypeStruct((R, 128), dtype),
                 jax.ShapeDtypeStruct((R, 128), dtype))
    return pl.pallas_call(
        kernel,
        out_shape=out_shape,
        grid=grid,
        in_specs=[pl.BlockSpec((tile_r, tile_m), lambda i, k: (i, k))],
        out_specs=(pl.BlockSpec((tile_r, 128), lambda i, k: (i, 0)),
                   pl.BlockSpec((tile_r, 128), lambda i, k: (i, 0))),
        compiler_params=pltpu.CompilerParams(
            dimension_semantics=("parallel", "arbitrary"),
            vmem_limit_bytes=_VMEM_LIMIT_BYTES,
        ),
    )(x2d)


def _choose_row_split(R, M, target_rows=256, min_lanes=1024):
    """Largest s dividing M with R*s <= target_rows and M/s >= min_lanes."""
    if R >= target_rows or M < 2 * min_lanes:
        return 1
    s_cap = min(target_rows // R, M // min_lanes)
    if s_cap < 2:
        return 1
    for s in range(s_cap, 1, -1):
        if M % s == 0:
            return s
    return 1


def _row_minmax(x2d):
    """Per-row min/max of a (R, M) array. Returns ((R,), (R,))."""
    R, M = x2d.shape
    s = _choose_row_split(R, M)
    if s > 1:  # zero-copy view: taller blocks / bigger DMAs for small-R trackers
        x2d = x2d.reshape(R * s, M // s)
    pmin, pmax = _minmax_partials(x2d)
    mn = jnp.min(pmin, axis=-1)
    mx = jnp.max(pmax, axis=-1)
    if s > 1:  # fold the s sub-rows back into each original row
        mn = jnp.min(mn.reshape(R, s), axis=-1)
        mx = jnp.max(mx.reshape(R, s), axis=-1)
    return mn, mx


def range_tracker_minmax(inputs, tracker_shape):
    """Tracker-shaped (min_val, max_val) of `inputs` (RangeTracker.forward core)."""
    if inputs.ndim != len(tracker_shape):
        raise ValueError("inputs rank must match tracker shape rank")
    keep_dims = [d for d, sz in enumerate(tracker_shape) if sz != 1]
    reduce_dims = [d for d, sz in enumerate(tracker_shape) if sz == 1]
    if not reduce_dims:
        return inputs, inputs  # degenerate: nothing to reduce

    last_keep = max(keep_dims) if keep_dims else -1
    trail_shape = inputs.shape[last_keep + 1:]
    m_trail = int(np.prod(trail_shape)) if trail_shape else 1

    if m_trail >= 128 or not keep_dims:
        # Fast path: contiguous (R, M) view, no HBM transpose.
        lead_shape = tuple(inputs.shape[: last_keep + 1])
        R = int(np.prod(lead_shape)) if lead_shape else 1
        mn, mx = _row_minmax(inputs.reshape(R, m_trail))
        mn = mn.reshape(lead_shape + (1,) * len(trail_shape))
        mx = mx.reshape(lead_shape + (1,) * len(trail_shape))
        lead_reduce = tuple(d for d in reduce_dims if d <= last_keep)
        if lead_reduce:  # tiny residual fold (e.g. the batch dim)
            mn = jnp.min(mn, axis=lead_reduce, keepdims=True)
            mx = jnp.max(mx, axis=lead_reduce, keepdims=True)
        return mn, mx

    # Fallback (tiny trailing reduce / keep dims at the end): permute exactly as
    # the reference module does, then reduce rows with the same kernel.
    permute_dims = [*keep_dims, *reduce_dims]
    repermute_dims = [permute_dims.index(d) for d in range(inputs.ndim)]
    xp = jnp.transpose(inputs, permute_dims)
    keep_shape = tuple(xp.shape[: len(keep_dims)])
    R = int(np.prod(keep_shape))
    M = int(np.prod(xp.shape[len(keep_dims):]))
    mn, mx = _row_minmax(xp.reshape(R, M))
    perm_shape = keep_shape + (1,) * len(reduce_dims)
    mn = jnp.transpose(mn.reshape(perm_shape), repermute_dims)
    mx = jnp.transpose(mx.reshape(perm_shape), repermute_dims)
    return mn, mx


def advanced_range_tracker_forward(inputs, tracker_shape, *, momentum=0.1,
                                   prev_min=None, prev_max=None):
    """AdvancedRangeTracker forward: tracked min/max + EMA update_range.

    Returns the updated (min_val, max_val) buffers (functional state).
    """
    min_val, max_val = range_tracker_minmax(inputs, tracker_shape)
    # TODO(synk): AdvancedRangeTracker.forward additionally clips the range to a
    # top-k subset ranked by a gradient/magnitude score (torch.topk + scatter_
    # mask on weights.grad); weight gradients are unavailable here, so only the
    # tracked min/max + EMA update_range is implemented.
    if prev_min is not None:
        min_val = prev_min * (1.0 - momentum) + min_val * momentum
    if prev_max is not None:
        max_val = prev_max * (1.0 - momentum) + max_val * momentum
    return min_val, max_val


if __name__ == "__main__":
    key = jax.random.PRNGKey(0)
    k1, k2, k3 = jax.random.split(key, 3)

    # 1) Per-channel activation tracker: tracker shape (1, C, 1, 1), NCHW input.
    N, C, H, W = 2, 4, 16, 16
    tracker_shape = (1, C, 1, 1)
    x = jax.random.normal(k1, (N, C, H, W), dtype=jnp.float32)

    min_val, max_val = advanced_range_tracker_forward(x, tracker_shape, momentum=0.1)
    min_val, max_val = jax.block_until_ready((min_val, max_val))
    ref_min = jnp.min(x, axis=(0, 2, 3), keepdims=True)
    ref_max = jnp.max(x, axis=(0, 2, 3), keepdims=True)
    assert min_val.shape == tracker_shape and max_val.shape == tracker_shape
    np.testing.assert_allclose(np.asarray(min_val), np.asarray(ref_min), rtol=0, atol=0)
    np.testing.assert_allclose(np.asarray(max_val), np.asarray(ref_max), rtol=0, atol=0)

    # EMA update_range with existing buffers.
    m = 0.1
    min2, _ = advanced_range_tracker_forward(
        x, tracker_shape, momentum=m, prev_min=max_val, prev_max=max_val)
    min2 = jax.block_until_ready(min2)
    np.testing.assert_allclose(
        np.asarray(min2), np.asarray(max_val * (1 - m) + ref_min * m),
        rtol=1e-6, atol=1e-6)

    # 2) Per-output-channel weight tracker: tracker shape (O, 1, 1, 1). Long,
    #    non-128-aligned reduce axis -> exercises the (R, M) -> (R*s, M/s) row
    #    split, boundary row block and the static partial-chunk tail.
    O, I, KH, KW = 16, 8, 45, 45
    w_tracker_shape = (O, 1, 1, 1)
    w = jax.random.normal(k2, (O, I, KH, KW), dtype=jnp.float32)
    wmin, wmax = advanced_range_tracker_forward(w, w_tracker_shape)
    wmin, wmax = jax.block_until_ready((wmin, wmax))
    ref_wmin = jnp.min(w, axis=(1, 2, 3), keepdims=True)
    ref_wmax = jnp.max(w, axis=(1, 2, 3), keepdims=True)
    np.testing.assert_allclose(np.asarray(wmin), np.asarray(ref_wmin), rtol=0, atol=0)
    np.testing.assert_allclose(np.asarray(wmax), np.asarray(ref_wmax), rtol=0, atol=0)

    # 3) Rank-2 tracker (R, 1) with R not a multiple of the row tile and M larger
    #    than one lane block -> exercises multi-lane-block reduction with the
    #    pl.when-gated tail fold and a clipped boundary row block.
    R3, M3 = 200, 9001
    y = jax.random.normal(k3, (R3, M3), dtype=jnp.float32)
    ymin, ymax = advanced_range_tracker_forward(y, (R3, 1))
    ymin, ymax = jax.block_until_ready((ymin, ymax))
    np.testing.assert_allclose(np.asarray(ymin),
                               np.asarray(jnp.min(y, axis=1, keepdims=True)),
                               rtol=0, atol=0)
    np.testing.assert_allclose(np.asarray(ymax),
                               np.asarray(jnp.max(y, axis=1, keepdims=True)),
                               rtol=0, atol=0)

    print("KERNEL_OK")
</pallas_src>

<mosaic_0001>
module attributes {stable_mosaic.version = 11 : i64} {
  func.func @kernel(%arg0: i32, %arg1: i32, %arg2: memref<8x256xf32, #tpu.memory_space<vmem>>, %arg3: memref<8x128xf32, #tpu.memory_space<vmem>>, %arg4: memref<8x128xf32, #tpu.memory_space<vmem>>) attributes {dimension_semantics = [#tpu.dimension_semantics<parallel>, #tpu.dimension_semantics<arbitrary>], iteration_bounds = array<i64: 1, 1>, scalar_prefetch = 0 : i64, scratch_operands = 0 : i64, tpu.core_type = #tpu.core_type<tc>, window_params = [{transform_indices = @transform_0, window_bounds = array<i64: 8, 256>}, {transform_indices = @transform_1, window_bounds = array<i64: 8, 128>}, {transform_indices = @transform_2, window_bounds = array<i64: 8, 128>}]} {
    %c0_i32 = arith.constant 0 : i32
    %0 = arith.cmpi eq, %arg1, %c0_i32 : i32
    %1 = arith.extui %0 : i1 to i32
    %c0_i32_0 = arith.constant 0 : i32
    %2 = arith.cmpi ne, %1, %c0_i32_0 : i32
    scf.if %2 {
      %cst = arith.constant 0x7F800000 : f32
      %13 = vector.broadcast %cst : f32 to vector<8x128xf32>
      %c0_11 = arith.constant 0 : index
      %c0_12 = arith.constant 0 : index
      %14 = vector.load %arg3[%c0_11, %c0_12] : memref<8x128xf32, #tpu.memory_space<vmem>>, vector<8x128xf32>
      tpu.vector_store %arg3[%c0_11, %c0_12], %13 {strides = array<i32>} : memref<8x128xf32, #tpu.memory_space<vmem>>, vector<8x128xf32>,
      %cst_13 = arith.constant 0xFF800000 : f32
      %15 = vector.broadcast %cst_13 : f32 to vector<8x128xf32>
      %c0_14 = arith.constant 0 : index
      %c0_15 = arith.constant 0 : index
      %16 = vector.load %arg4[%c0_14, %c0_15] : memref<8x128xf32, #tpu.memory_space<vmem>>, vector<8x128xf32>
      tpu.vector_store %arg4[%c0_14, %c0_15], %15 {strides = array<i32>} : memref<8x128xf32, #tpu.memory_space<vmem>>, vector<8x128xf32>,
    } else {
    }
    %c0 = arith.constant 0 : index
    %c0_1 = arith.constant 0 : index
    %3 = vector.load %arg3[%c0, %c0_1] : memref<8x128xf32, #tpu.memory_space<vmem>>, vector<8x128xf32>
    %c0_2 = arith.constant 0 : index
    %c0_3 = arith.constant 0 : index
    %4 = vector.load %arg4[%c0_2, %c0_3] : memref<8x128xf32, #tpu.memory_space<vmem>>, vector<8x128xf32>
    %c0_4 = arith.constant 0 : index
    %c0_5 = arith.constant 0 : index
    %5 = vector.load %arg2[%c0_4, %c0_5] : memref<8x256xf32, #tpu.memory_space<vmem>>, vector<8x128xf32>
    %6 = arith.minimumf %3, %5 : vector<8x128xf32>
    %7 = arith.maximumf %4, %5 : vector<8x128xf32>
    %c0_6 = arith.constant 0 : index
    %c128 = arith.constant 128 : index
    %8 = vector.load %arg2[%c0_6, %c128] : memref<8x256xf32, #tpu.memory_space<vmem>>, vector<8x128xf32>
    %9 = arith.minimumf %6, %8 : vector<8x128xf32>
    %10 = arith.maximumf %7, %8 : vector<8x128xf32>
    %c0_7 = arith.constant 0 : index
    %c0_8 = arith.constant 0 : index
    %11 = vector.load %arg3[%c0_7, %c0_8] : memref<8x128xf32, #tpu.memory_space<vmem>>, vector<8x128xf32>
    tpu.vector_store %arg3[%c0_7, %c0_8], %9 {strides = array<i32>} : memref<8x128xf32, #tpu.memory_space<vmem>>, vector<8x128xf32>,
    %c0_9 = arith.constant 0 : index
    %c0_10 = arith.constant 0 : index
    %12 = vector.load %arg4[%c0_9, %c0_10] : memref<8x128xf32, #tpu.memory_space<vmem>>, vector<8x128xf32>
    tpu.vector_store %arg4[%c0_9, %c0_10], %10 {strides = array<i32>} : memref<8x128xf32, #tpu.memory_space<vmem>>, vector<8x128xf32>,
    return
  }
  func.func @transform_0(%arg0: i32, %arg1: i32) -> (i32, i32) {
    %c0_i32 = arith.constant 0 : i32
    return %arg0, %arg1 : i32, i32
  }
  func.func @transform_1(%arg0: i32, %arg1: i32) -> (i32, i32) {
    %c0_i32 = arith.constant 0 : i32
    %c0_i32_0 = arith.constant 0 : i32
    return %arg0, %c0_i32 : i32, i32
  }
  func.func @transform_2(%arg0: i32, %arg1: i32) -> (i32, i32) {
    %c0_i32 = arith.constant 0 : i32
    %c0_i32_0 = arith.constant 0 : i32
    return %arg0, %c0_i32 : i32, i32
  }
}

</mosaic_0001>

<bundles_post_ra>
// kernel: tpu_custom_call.1
= control target key start
LH: loop header
LB: loop body
LE: loop exit
PB: predicated region body
PF: predicated region fallthrough
CT: control target
= control target key end

     0   :  { %8 = vsyncpa [#allocation3], 0  ;;  %s185_s0 = inlined_call_operand.hbm [shape: f32[8,256], index: 0, kind: input, shape index: {}]   ;;  %s186_s1 = inlined_call_operand.hbm [shape: f32[8,128], index: 1, kind: output, shape index: {0}]   ;;  %s187_s2 = inlined_call_operand.hbm [shape: f32[8,128], index: 2, kind: output, shape index: {1}]  }
   0x1   :  { %9 = vsyncpa [#allocation4], 0 }
   0x2   :  { %10 = vsyncpa [#allocation7], 0  ;;  %s16_s11 = sshll.u32 %s185_s0, 4  ;;  %s158_s12 = smov [#allocation2]   ;;  %s17_s11 = int_to_ptr.hbm [resolvable:$true] %s16_s11 }
   0x3   :  { %s18_s13 = sshll.u32 %s158_s12, 4  ;;  %s19_s13 = int_to_ptr.vmem [resolvable:$true] %s18_s13 }
   0x4   :  { %21 = dma.hbm_to_vmem [thread:$0]  %s17_s11, 256, %s19_s13, [#allocation3]  }
   0x5   :  { %152 = dma.done.wait [#allocation3], 256  }
   0x6   :  { %153 = vsyncadd [#allocation3], 4294967040  ;;  %v34_v0 = vld [vmem:[#allocation2] sm:$0xff]  ;;  %v37_v1 = vld [vmem:[#allocation2 + $0x8] sm:$0xff]  ;;  %s159_s14 = smov [#allocation5]   ;;  %s49_s18 = sshll.u32 %s186_s1, 4  ;;  %s50_s18 = int_to_ptr.hbm [resolvable:$true] %s49_s18 }
   0x7   :  { %s47_s15 = sshll.u32 %s159_s14, 4  ;;  %s160_s19 = smov [#allocation6]   ;;  %v38_v2 = vmin.f32 %v34_v0, %v37_v1  ;;  %v39_v3 = vmax.f32 %v34_v0, %v37_v1  ;;  %s48_s15 = int_to_ptr.vmem [resolvable:$true] %s47_s15 }
   0x8   :  { %s58_s20 = sshll.u32 %s160_s19, 4  ;;  %s60_s0 = sshll.u32 %s187_s2, 4  ;;  %s59_s20 = int_to_ptr.vmem [resolvable:$true] %s58_s20  ;;  %s61_s0 = int_to_ptr.hbm [resolvable:$true] %s60_s0 }
   0x9   :  { %40 = vst [vmem:[#allocation5] sm:$0xff] %v38_v2 }
   0xa   :  { %41 = vst [vmem:[#allocation6] sm:$0xff] %v39_v3  ;;  %52 = dma.vmem_to_hbm [thread:$0]  %s48_s15, 128, %s50_s18, [#allocation4]  }
   0xb   :  { %63 = dma.vmem_to_hbm [thread:$0]  %s59_s20, 128, %s61_s0, [#allocation7]  }
   0xc   :  { %154 = dma.done.wait [#allocation4], 128  }
   0xd   :  { %155 = vsyncadd [#allocation4], 4294967168 }
   0xe   :  { %156 = dma.done.wait [#allocation7], 128  }
   0xf   :  { %157 = vsyncadd [#allocation7], 4294967168 }
  0x10   :  { %72 = vsyncpa [#allocation3], 1 }
  0x11   :  { %73 = vsyncpa [#allocation4], 1 }
  0x12   :  { %74 = vsyncpa [#allocation7], 1 }

</bundles_post_ra>
